<compile_context>
chip_gen: v7x
topology: tpu7x:2x2x1
jax: 0.10.0
libtpu: 0.0.40
codegen_flags: <defaults>
</compile_context>

<pallas_src>
import functools

import jax
import jax.numpy as jnp
from jax import lax
from jax.experimental import pallas as pl
from jax.experimental.pallas import tpu as pltpu


def _orthopq_kernel(x_ref, rhs_ref, cb_ref, lab_ref,
                    out1_ref, out2_ref, soft_ref, *, scale, margin):
    """One (book, batch-tile) step of the OrthoPQ forward pass.

    x_ref   : (TB, L)       f32  this book's slice of the input rows
    rhs_ref : (1, L, O+W)   bf16 [ normalize(weight).T | mlp ] for this book
    cb_ref  : (1, L, W)     bf16 codebook for this book
    lab_ref : (TB, 1)       int32 labels for this batch tile
    out1/out2 : (TB, O)     f32  margin logits (column block `book`)
    soft_ref  : (TB, W)     f32  softmax codes (column block `book`)
    """
    x = x_ref[...]                      # (TB, L) f32
    rhs = rhs_ref[0]                    # (L, O+W) bf16
    cb = cb_ref[0]                      # (L, W) bf16
    lab = lab_ref[...]                  # (TB, 1) int32

    tb, out_features = out1_ref.shape
    eps2 = 1e-24                        # (F.normalize eps = 1e-12) ** 2

    # Reciprocal row norm of x (f32, EUP rsqrt). Applied to the matmul result
    # instead of normalizing x before the matmul: a (TB, O) scale replaces a
    # (TB, L) operand rewrite and equals normalize(x) @ wn.T exactly.
    x_inv = lax.rsqrt(jnp.maximum(jnp.sum(x * x, axis=1, keepdims=True), eps2))

    # Single fused matmul with N = O + W (fills the 256-wide MXU on v6e/v7x).
    fused = jnp.dot(x.astype(jnp.bfloat16), rhs,
                    preferred_element_type=jnp.float32)          # (TB, O+W)
    cos_xw = fused[:, :out_features] * x_inv                     # normalize(x) @ wn.T
    logits = fused[:, out_features:]                             # x @ mlp

    # softmax over words (elementwise in f32; EUP approx reciprocal for denom).
    logits = logits - jnp.max(logits, axis=1, keepdims=True)
    e = jnp.exp(logits)
    soft = e * pl.reciprocal(jnp.sum(e, axis=1, keepdims=True), approx=True)

    # s = soft @ codebook.T ; cosine_sw = normalize(s) @ wn.T, with the
    # normalization applied to the matmul result (no (TB, L) `sn` temp).
    contract_last = (((1,), (1,)), ((), ()))                     # A(m,k).B(n,k)
    smt = lax.dot_general(soft.astype(jnp.bfloat16), cb, contract_last,
                          preferred_element_type=jnp.float32)    # (TB, L)
    s_inv = lax.rsqrt(jnp.maximum(jnp.sum(smt * smt, axis=1, keepdims=True), eps2))
    cos_sw = jnp.dot(smt.astype(jnp.bfloat16), rhs[:, :out_features],
                     preferred_element_type=jnp.float32) * s_inv  # (TB, O)

    cos_xw = jnp.clip(cos_xw, -1.0, 1.0)
    cos_sw = jnp.clip(cos_sw, -1.0, 1.0)

    # Margin on the label class: one vselect per vreg, no f32 one-hot.
    col = lax.broadcasted_iota(jnp.int32, (tb, out_features), 1)
    hit = col == lab                                             # (TB, O) bool
    out1_ref[...] = (jnp.where(hit, cos_xw - margin, cos_xw) * scale
                     ).astype(out1_ref.dtype)
    out2_ref[...] = (jnp.where(hit, cos_sw - margin, cos_sw) * scale
                     ).astype(out2_ref.dtype)
    soft_ref[...] = soft.astype(soft_ref.dtype)


def orthopq_forward(x, label, weight, mlp, codebooks, *,
                    sc=30.0, m=0.5, batch_tile=512):
    """Pallas implementation of OrthoPQ.forward.

    x:         (B, in_features) float32
    label:     (B,) int32
    weight:    (num_books, out_features, len_word) float32
    mlp:       (num_books, len_word, num_words) float32
    codebooks: (num_books, len_word, num_words) float32
    Returns (output1, output2, xc_softmax) with shapes
      (B, num_books, out_features), (B, num_books, out_features),
      (B, num_books, num_words)  — matching the PyTorch transposes.
    """
    B, in_features = x.shape
    num_books, out_features, len_word = weight.shape
    num_words = mlp.shape[2]
    assert in_features == num_books * len_word

    # Lane-dense column blocking requires 128-aligned feature dims when there is
    # more than one book (otherwise a per-book column block is a partial lane).
    # TODO(synk): add padding / book-grouping for dims that are not multiples of 128.
    if num_books > 1 and any(d % 128 for d in (len_word, out_features, num_words)):
        raise ValueError(
            "orthopq_forward expects len_word, out_features and num_words to be "
            "multiples of 128 (or num_books == 1); pad the model dims first.")

    # Batch tile: multiple of 8 (sublane) or the full batch.
    tb = min(batch_tile, B)
    if tb != B:
        tb = max(8, (tb // 8) * 8)
    n_bt = pl.cdiv(B, tb)

    label2d = label.astype(jnp.int32).reshape(B, 1)

    # One-time wrapper prep (hoisted out of the kernel): normalize class weights
    # along len_word, transpose to (L, O), fuse with mlp into a single (L, O+W)
    # RHS, and cast matmul operands to bf16 (f32 accumulation in-kernel).
    wnorm = weight / jnp.maximum(
        jnp.sqrt(jnp.sum(weight * weight, axis=2, keepdims=True)), 1e-12)
    rhs = jnp.concatenate(
        [jnp.transpose(wnorm, (0, 2, 1)), mlp], axis=2).astype(jnp.bfloat16)
    cb_bf = codebooks.astype(jnp.bfloat16)
    n_fused = out_features + num_words

    # Static python floats -> no captured jax-array constants in the kernel.
    kernel = functools.partial(_orthopq_kernel, scale=float(sc), margin=float(m))

    out_shapes = (
        jax.ShapeDtypeStruct((B, num_books * out_features), jnp.float32),
        jax.ShapeDtypeStruct((B, num_books * out_features), jnp.float32),
        jax.ShapeDtypeStruct((B, num_books * num_words), jnp.float32),
    )

    grid_spec = pltpu.PrefetchScalarGridSpec(
        num_scalar_prefetch=0,
        grid=(num_books, n_bt),                 # (book, batch tile)
        in_specs=[
            # x: batch-tile rows, this book's feature columns (no HBM transpose).
            pl.BlockSpec((tb, len_word), lambda b, t: (t, b)),
            # per-book fused [wn.T | mlp]: resident across the inner batch loop.
            pl.BlockSpec((1, len_word, n_fused), lambda b, t: (b, 0, 0)),
            # per-book codebook: also resident across the inner batch loop.
            pl.BlockSpec((1, len_word, num_words), lambda b, t: (b, 0, 0)),
            # labels as a thin int32 column (no dense one-hot).
            pl.BlockSpec((tb, 1), lambda b, t: (t, 0)),
        ],
        out_specs=[
            # Book b writes column block b of (B, num_books*·): the final reshape
            # to the PyTorch (B, num_books, ·) layout is a free row-major view.
            pl.BlockSpec((tb, out_features), lambda b, t: (t, b)),
            pl.BlockSpec((tb, out_features), lambda b, t: (t, b)),
            pl.BlockSpec((tb, num_words), lambda b, t: (t, b)),
        ],
    )

    out1, out2, soft = pl.pallas_call(
        kernel,
        grid_spec=grid_spec,
        out_shape=out_shapes,
        compiler_params=pltpu.CompilerParams(
            dimension_semantics=("parallel", "parallel"),
            vmem_limit_bytes=32 * 1024 * 1024),
    )(x, rhs, cb_bf, label2d)

    return (out1.reshape(B, num_books, out_features),
            out2.reshape(B, num_books, out_features),
            soft.reshape(B, num_books, num_words))


def _reference_forward(x, label, weight, mlp, codebooks, sc, m):
    """Pure-JAX f32 reference mirroring the PyTorch module, for validation."""
    B, in_features = x.shape
    num_books, out_features, len_word = weight.shape
    eps = 1e-12
    x_books = jnp.transpose(x.reshape(B, num_books, len_word), (1, 0, 2))
    wn = weight / jnp.maximum(jnp.linalg.norm(weight, axis=2, keepdims=True), eps)
    xn = x_books / jnp.maximum(jnp.linalg.norm(x_books, axis=2, keepdims=True), eps)
    cos_xw = jnp.einsum('kbl,kol->kbo', xn, wn)
    soft = jax.nn.softmax(jnp.einsum('kbl,klw->kbw', x_books, mlp), axis=2)
    s_m = jnp.einsum('klw,kbw->klb', codebooks, soft)
    smt = jnp.transpose(s_m, (0, 2, 1))
    sn = smt / jnp.maximum(jnp.linalg.norm(smt, axis=2, keepdims=True), eps)
    cos_sw = jnp.einsum('kbl,kol->kbo', sn, wn)
    cos_xw = jnp.clip(cos_xw, -1.0, 1.0)
    cos_sw = jnp.clip(cos_sw, -1.0, 1.0)
    oh = jax.nn.one_hot(label, out_features, dtype=jnp.float32)[None]
    o1 = (oh * (cos_xw - m) + (1.0 - oh) * cos_xw) * sc
    o2 = (oh * (cos_sw - m) + (1.0 - oh) * cos_sw) * sc
    return (jnp.transpose(o1, (1, 0, 2)),
            jnp.transpose(o2, (1, 0, 2)),
            jnp.transpose(soft, (1, 0, 2)))


if __name__ == "__main__":
    import numpy as np

    # Small but TPU-friendly (lane-dense) shapes consistent with the module.
    B = 32
    num_books = 2
    len_word = 128
    in_features = num_books * len_word        # 256
    num_words = 128
    out_features = 128                        # number of classes
    sc, m = 30.0, 0.5

    key = jax.random.PRNGKey(0)
    k_x, k_w, k_mlp, k_cb, k_lab = jax.random.split(key, 5)

    x = jax.random.normal(k_x, (B, in_features), dtype=jnp.float32)
    label = jax.random.randint(k_lab, (B,), 0, out_features, dtype=jnp.int32)

    # Deterministic xavier-uniform-style init (bound = sqrt(6/(fan_in+fan_out))).
    def xavier(k, shape):
        fan_out = shape[0] * int(np.prod(shape[2:]))
        fan_in = shape[1] * int(np.prod(shape[2:]))
        bound = float(np.sqrt(6.0 / (fan_in + fan_out)))
        return jax.random.uniform(k, shape, jnp.float32, -bound, bound)

    weight = xavier(k_w, (num_books, out_features, len_word))
    mlp = xavier(k_mlp, (num_books, len_word, num_words))
    codebooks = jax.random.normal(k_cb, (num_books, len_word, num_words),
                                  dtype=jnp.float32)

    out1, out2, soft = orthopq_forward(x, label, weight, mlp, codebooks,
                                       sc=sc, m=m)
    jax.block_until_ready((out1, out2, soft))

    r1, r2, rs = _reference_forward(x, label, weight, mlp, codebooks, sc, m)
    # Tolerance absorbs bf16 matmul operands (cosine error ~1e-3, amplified by
    # the s=30 scale) and the approx EUP reciprocal in the softmax; genuine
    # layout/indexing bugs here would be O(1)-O(30).
    np.testing.assert_allclose(np.asarray(out1), np.asarray(r1), rtol=3e-2, atol=6e-2)
    np.testing.assert_allclose(np.asarray(out2), np.asarray(r2), rtol=3e-2, atol=6e-2)
    np.testing.assert_allclose(np.asarray(soft), np.asarray(rs), rtol=3e-2, atol=1e-2)

    print("KERNEL_OK")
</pallas_src>

<mosaic_0001>
module attributes {stable_mosaic.version = 11 : i64} {
  func.func @_orthopq_kernel(%arg0: i32, %arg1: i32, %arg2: memref<32x128xf32, #tpu.memory_space<vmem>>, %arg3: memref<1x128x256xbf16, #tpu.memory_space<vmem>>, %arg4: memref<1x128x128xbf16, #tpu.memory_space<vmem>>, %arg5: memref<32x1xi32, #tpu.memory_space<vmem>>, %arg6: memref<32x128xf32, #tpu.memory_space<vmem>>, %arg7: memref<32x128xf32, #tpu.memory_space<vmem>>, %arg8: memref<32x128xf32, #tpu.memory_space<vmem>>) attributes {dimension_semantics = [#tpu.dimension_semantics<parallel>, #tpu.dimension_semantics<parallel>], iteration_bounds = array<i64: 2, 1>, scalar_prefetch = 0 : i64, scratch_operands = 0 : i64, tpu.core_type = #tpu.core_type<tc>, window_params = [{transform_indices = @transform_0, window_bounds = array<i64: 32, 128>}, {transform_indices = @transform_1, window_bounds = array<i64: 1, 128, 256>}, {transform_indices = @transform_2, window_bounds = array<i64: 1, 128, 128>}, {transform_indices = @transform_3, window_bounds = array<i64: 32, 1>}, {transform_indices = @transform_4, window_bounds = array<i64: 32, 128>}, {transform_indices = @transform_5, window_bounds = array<i64: 32, 128>}, {transform_indices = @transform_6, window_bounds = array<i64: 32, 128>}]} {
    %c0 = arith.constant 0 : index
    %c0_0 = arith.constant 0 : index
    %0 = vector.load %arg2[%c0, %c0_0] : memref<32x128xf32, #tpu.memory_space<vmem>>, vector<32x128xf32>
    %c0_1 = arith.constant 0 : index
    %c0_2 = arith.constant 0 : index
    %c0_3 = arith.constant 0 : index
    %1 = vector.load %arg3[%c0_1, %c0_2, %c0_3] : memref<1x128x256xbf16, #tpu.memory_space<vmem>>, vector<1x128x256xbf16>
    %2 = vector.shape_cast %1 : vector<1x128x256xbf16> to vector<128x256xbf16>
    %c0_4 = arith.constant 0 : index
    %c0_5 = arith.constant 0 : index
    %c0_6 = arith.constant 0 : index
    %3 = vector.load %arg4[%c0_4, %c0_5, %c0_6] : memref<1x128x128xbf16, #tpu.memory_space<vmem>>, vector<1x128x128xbf16>
    %4 = vector.shape_cast %3 : vector<1x128x128xbf16> to vector<128x128xbf16>
    %c0_7 = arith.constant 0 : index
    %c0_8 = arith.constant 0 : index
    %5 = vector.load %arg5[%c0_7, %c0_8] : memref<32x1xi32, #tpu.memory_space<vmem>>, vector<32x1xi32>
    %6 = arith.mulf %0, %0 : vector<32x128xf32>
    %cst = arith.constant dense<0.000000e+00> : vector<32xf32>
    %7 = vector.multi_reduction <add>, %6, %cst [1] : vector<32x128xf32> to vector<32xf32>
    %8 = vector.shape_cast %7 : vector<32xf32> to vector<32x1xf32>
    %cst_9 = arith.constant 1.000000e-24 : f32
    %9 = vector.broadcast %cst_9 : f32 to vector<32x1xf32>
    %10 = arith.maximumf %8, %9 : vector<32x1xf32>
    %11 = math.rsqrt %10 : vector<32x1xf32>
    %12 = arith.truncf %0 : vector<32x128xf32> to vector<32x128xbf16>
    %cst_10 = arith.constant dense<0.000000e+00> : vector<32x256xf32>
    %13 = tpu.matmul %12, %2, %cst_10 {dimension_numbers = #tpu.dot_dimension_numbers<[1], [0], [0], [1], [0, 0, 1, 1], [], []>} : vector<32x128xbf16>, vector<128x256xbf16>, vector<32x256xf32> -> vector<32x256xf32>
    %14 = vector.extract_strided_slice %13 {offsets = [0, 0], sizes = [32, 128], strides = [1, 1]} : vector<32x256xf32> to vector<32x128xf32>
    %15 = vector.broadcast %11 : vector<32x1xf32> to vector<32x128xf32>
    %16 = arith.mulf %14, %15 : vector<32x128xf32>
    %17 = vector.extract_strided_slice %13 {offsets = [0, 128], sizes = [32, 128], strides = [1, 1]} : vector<32x256xf32> to vector<32x128xf32>
    %cst_11 = arith.constant dense<0xFF800000> : vector<32xf32>
    %18 = vector.multi_reduction <maximumf>, %17, %cst_11 [1] : vector<32x128xf32> to vector<32xf32>
    %19 = vector.shape_cast %18 : vector<32xf32> to vector<32x1xf32>
    %20 = vector.broadcast %19 : vector<32x1xf32> to vector<32x128xf32>
    %21 = arith.subf %17, %20 : vector<32x128xf32>
    %22 = math.exp %21 : vector<32x128xf32>
    %cst_12 = arith.constant dense<0.000000e+00> : vector<32xf32>
    %23 = vector.multi_reduction <add>, %22, %cst_12 [1] : vector<32x128xf32> to vector<32xf32>
    %24 = vector.shape_cast %23 : vector<32xf32> to vector<32x1xf32>
    %25 = tpu.reciprocal %24 {approx = true} : vector<32x1xf32> -> vector<32x1xf32>
    %26 = vector.broadcast %25 : vector<32x1xf32> to vector<32x128xf32>
    %27 = arith.mulf %22, %26 : vector<32x128xf32>
    %28 = arith.truncf %27 : vector<32x128xf32> to vector<32x128xbf16>
    %cst_13 = arith.constant dense<0.000000e+00> : vector<32x128xf32>
    %29 = tpu.matmul %28, %4, %cst_13 {dimension_numbers = #tpu.dot_dimension_numbers<[1], [1], [0], [0], [0, 0, 1, 0], [], []>} : vector<32x128xbf16>, vector<128x128xbf16>, vector<32x128xf32> -> vector<32x128xf32>
    %30 = arith.mulf %29, %29 : vector<32x128xf32>
    %cst_14 = arith.constant dense<0.000000e+00> : vector<32xf32>
    %31 = vector.multi_reduction <add>, %30, %cst_14 [1] : vector<32x128xf32> to vector<32xf32>
    %32 = vector.shape_cast %31 : vector<32xf32> to vector<32x1xf32>
    %cst_15 = arith.constant 1.000000e-24 : f32
    %33 = vector.broadcast %cst_15 : f32 to vector<32x1xf32>
    %34 = arith.maximumf %32, %33 : vector<32x1xf32>
    %35 = math.rsqrt %34 : vector<32x1xf32>
    %36 = arith.truncf %29 : vector<32x128xf32> to vector<32x128xbf16>
    %37 = vector.extract_strided_slice %2 {offsets = [0, 0], sizes = [128, 128], strides = [1, 1]} : vector<128x256xbf16> to vector<128x128xbf16>
    %cst_16 = arith.constant dense<0.000000e+00> : vector<32x128xf32>
    %38 = tpu.matmul %36, %37, %cst_16 {dimension_numbers = #tpu.dot_dimension_numbers<[1], [0], [0], [1], [0, 0, 1, 1], [], []>} : vector<32x128xbf16>, vector<128x128xbf16>, vector<32x128xf32> -> vector<32x128xf32>
    %39 = vector.broadcast %35 : vector<32x1xf32> to vector<32x128xf32>
    %40 = arith.mulf %38, %39 : vector<32x128xf32>
    %cst_17 = arith.constant -1.000000e+00 : f32
    %cst_18 = arith.constant 1.000000e+00 : f32
    %41 = vector.broadcast %cst_17 : f32 to vector<32x128xf32>
    %42 = arith.maximumf %41, %16 : vector<32x128xf32>
    %43 = vector.broadcast %cst_18 : f32 to vector<32x128xf32>
    %44 = arith.minimumf %43, %42 : vector<32x128xf32>
    %cst_19 = arith.constant -1.000000e+00 : f32
    %cst_20 = arith.constant 1.000000e+00 : f32
    %45 = vector.broadcast %cst_19 : f32 to vector<32x128xf32>
    %46 = arith.maximumf %45, %40 : vector<32x128xf32>
    %47 = vector.broadcast %cst_20 : f32 to vector<32x128xf32>
    %48 = arith.minimumf %47, %46 : vector<32x128xf32>
    %49 = tpu.iota {dimensions = array<i32: 1>} : vector<32x128xi32>
    %50 = vector.broadcast %5 : vector<32x1xi32> to vector<32x128xi32>
    %51 = arith.cmpi eq, %49, %50 : vector<32x128xi32>
    %cst_21 = arith.constant 5.000000e-01 : f32
    %52 = vector.broadcast %cst_21 : f32 to vector<32x128xf32>
    %53 = arith.subf %44, %52 : vector<32x128xf32>
    %54 = arith.select %51, %53, %44 : vector<32x128xi1>, vector<32x128xf32>
    %cst_22 = arith.constant 3.000000e+01 : f32
    %55 = vector.broadcast %cst_22 : f32 to vector<32x128xf32>
    %56 = arith.mulf %54, %55 : vector<32x128xf32>
    %c0_23 = arith.constant 0 : index
    %c0_24 = arith.constant 0 : index
    %57 = vector.load %arg6[%c0_23, %c0_24] : memref<32x128xf32, #tpu.memory_space<vmem>>, vector<32x128xf32>
    tpu.vector_store %arg6[%c0_23, %c0_24], %56 {strides = array<i32>} : memref<32x128xf32, #tpu.memory_space<vmem>>, vector<32x128xf32>,
    %cst_25 = arith.constant 5.000000e-01 : f32
    %58 = vector.broadcast %cst_25 : f32 to vector<32x128xf32>
    %59 = arith.subf %48, %58 : vector<32x128xf32>
    %60 = arith.select %51, %59, %48 : vector<32x128xi1>, vector<32x128xf32>
    %cst_26 = arith.constant 3.000000e+01 : f32
    %61 = vector.broadcast %cst_26 : f32 to vector<32x128xf32>
    %62 = arith.mulf %60, %61 : vector<32x128xf32>
    %c0_27 = arith.constant 0 : index
    %c0_28 = arith.constant 0 : index
    %63 = vector.load %arg7[%c0_27, %c0_28] : memref<32x128xf32, #tpu.memory_space<vmem>>, vector<32x128xf32>
    tpu.vector_store %arg7[%c0_27, %c0_28], %62 {strides = array<i32>} : memref<32x128xf32, #tpu.memory_space<vmem>>, vector<32x128xf32>,
    %c0_29 = arith.constant 0 : index
    %c0_30 = arith.constant 0 : index
    %64 = vector.load %arg8[%c0_29, %c0_30] : memref<32x128xf32, #tpu.memory_space<vmem>>, vector<32x128xf32>
    tpu.vector_store %arg8[%c0_29, %c0_30], %27 {strides = array<i32>} : memref<32x128xf32, #tpu.memory_space<vmem>>, vector<32x128xf32>,
    return
  }
  func.func @transform_0(%arg0: i32, %arg1: i32) -> (i32, i32) {
    %c0_i32 = arith.constant 0 : i32
    return %arg1, %arg0 : i32, i32
  }
  func.func @transform_1(%arg0: i32, %arg1: i32) -> (i32, i32, i32) {
    %c0_i32 = arith.constant 0 : i32
    %c0_i32_0 = arith.constant 0 : i32
    %c0_i32_1 = arith.constant 0 : i32
    return %arg0, %c0_i32, %c0_i32_0 : i32, i32, i32
  }
  func.func @transform_2(%arg0: i32, %arg1: i32) -> (i32, i32, i32) {
    %c0_i32 = arith.constant 0 : i32
    %c0_i32_0 = arith.constant 0 : i32
    %c0_i32_1 = arith.constant 0 : i32
    return %arg0, %c0_i32, %c0_i32_0 : i32, i32, i32
  }
  func.func @transform_3(%arg0: i32, %arg1: i32) -> (i32, i32) {
    %c0_i32 = arith.constant 0 : i32
    %c0_i32_0 = arith.constant 0 : i32
    return %arg1, %c0_i32 : i32, i32
  }
  func.func @transform_4(%arg0: i32, %arg1: i32) -> (i32, i32) {
    %c0_i32 = arith.constant 0 : i32
    return %arg1, %arg0 : i32, i32
  }
  func.func @transform_5(%arg0: i32, %arg1: i32) -> (i32, i32) {
    %c0_i32 = arith.constant 0 : i32
    return %arg1, %arg0 : i32, i32
  }
  func.func @transform_6(%arg0: i32, %arg1: i32) -> (i32, i32) {
    %c0_i32 = arith.constant 0 : i32
    return %arg1, %arg0 : i32, i32
  }
}

</mosaic_0001>

<bundles_post_ra>
// kernel: tpu_custom_call.1
= control target key start
LH: loop header
LB: loop body
LE: loop exit
PB: predicated region body
PF: predicated region fallthrough
CT: control target
= control target key end

     0   :  { %s2227_s0 = inlined_call_operand.hbm [shape: f32[32,256], index: 0, kind: input, shape index: {}]   ;;  %s2228_s1 = inlined_call_operand.hbm [shape: bf16[2,128,256], index: 1, kind: input, shape index: {}]   ;;  %s2229_s2 = inlined_call_operand.hbm [shape: bf16[2,128,128], index: 2, kind: input, shape index: {}]   ;;  %s2230_s3 = inlined_call_operand.vmem [shape: s32[32,1], index: 3, kind: input, shape index: {}]   ;;  %s2231_s4 = inlined_call_operand.hbm [shape: f32[32,256], index: 4, kind: output, shape index: {0}]   ;;  %s2232_s5 = inlined_call_operand.hbm [shape: f32[32,256], index: 5, kind: output, shape index: {1}]   ;;  %s2233_s6 = inlined_call_operand.hbm [shape: f32[32,256], index: 6, kind: output, shape index: {2}]  }
   0x1   :  { %2244 = sst [smem:[#allocation21_spill]] %s2227_s0 }
   0x2   :  { %2245 = sst [smem:[#allocation22_spill]] %s2228_s1 }
   0x3   :  { %12 = vsyncpa [#allocation3], 0 }
   0x4   :  { %14 = vsyncpa [#allocation3 + $0x1], 0 }
   0x5   :  { %15 = vsyncpa [#allocation6], 0 }
   0x6   :  { %17 = vsyncpa [#allocation6 + $0x1], 0 }
   0x7   :  { %18 = vsyncpa [#allocation4], 0 }
   0x8   :  { %20 = vsyncpa [#allocation4 + $0x1], 0 }
   0x9   :  { %21 = vsyncpa [#allocation10], 0 }
   0xa   :  { %23 = vsyncpa [#allocation10 + $0x1], 0  ;;  %s1738_s21 = smov 0   ;;  %s1740_s22 = smov 0  }
   0xb   :  { %s1742_s23 = smov 0   ;;  %s1744_s24 = smov 0  }
   0xc   :  { %s1746_s25 = smov 0   ;;  %s1748_s26 = smov 0  }
   0xd LB: > { %2246 = sst [smem:[#allocation16_spill]] %s1674_s23  ;;  %s1769_s27 = sadd.s32 4294967295, %s1686_s26   ;;  %s1686_s26 = sphi %s1748_s26, %s29_s26   ;;  %s1682_s25 = sphi %s1746_s25, %s2276_s25   ;;  %s1678_s24 = sphi %s1744_s24, %s2275_s24   ;;  %s1674_s23 = sphi %s1742_s23, %s2271_s23   ;;  %s1670_s22 = sphi %s1740_s22, %s2274_s22   ;;  %s1666_s21 = sphi %s1738_s21, %s2273_s21  }
   0xe   : > { %2247 = sst [smem:[#allocation17_spill]] %s1686_s26  ;;  %s2234_s28 = sadd.s32 4294967294, %s1686_s26  }
   0xf   : > { %s41_s29 = sadd.s32 1, %s1682_s25  ;;  %s50_s30 = sadd.s32 1, %s1674_s23 }
  0x10   : > { %p43_p0 = scmp.ge.s32.totalorder %s41_s29, 2  ;;  %p57_p1 = scmp.ne.s32.totalorder %s1674_s23, %s1670_s22 }
  0x11   : > { %p58_p2 = scmp.eq.s32.totalorder %s1686_s26, 0  ;;  %p63_p3 = scmp.ne.s32.totalorder %s1670_s22, %s1666_s21 }
  0x12   : > { %s2278_s29 = smov (%p43_p0, %s41_s29), 0  ;;  %p64_p5 = scmp.eq.s32.totalorder %s1769_s27, 0 }
  0x13   : > { %2248 = sst [smem:[#allocation18_spill]] %s2278_s29  ;;  %p1781_p4 = por %p58_p2, %p57_p1 }
  0x14   : > { %s46_s8 = ssub.s32 %s1682_s25, %s2278_s29  ;;  %p167_p6 = scmp.eq.s32.totalorder %s1769_s27, 1 }
  0x15   : > { %p48_p7 = scmp.eq.s32.totalorder %s46_s8, 0  ;;  %p1789_p8 = por %p64_p5, %p63_p3 }
  0x16   : > { %p1793_p9 = por %p167_p6, %p57_p1  ;;  %p173_p10 = scmp.eq.s32.totalorder %s2234_s28, 1 }
  0x17   : > { %s2250_s9 = scalar_select %p1789_p8, 1, 0 }
  0x18   : > { %s2251_s10 = scalar_select %p1793_p9, 1, 0 }
  0x19   : > { %s1800_s11 = scalar_select %p48_p7, %s1674_s23, %s50_s30  }
  0x1a   : > { %p1802_p11 = por %p173_p10, %p63_p3  ;;  %p1325_p13 = scmp.lt.s32.totalorder %s1686_s26, 2 }
  0x1b   : > { %2252 = sst [smem:[#allocation19_spill]] %s1800_s11  ;;  %s1809_s13 = sand.u32 1, %s1674_s23  }
  0x1c   : > { %s2253_s12 = scalar_select %p1802_p11, 1, 0 }
  0x1d   : > { %p1813_p0 = pnand %p1325_p13, %p1781_p4  ;;  %s281_s15 = sand.u32 1, %s1686_s26  }
  0x1e   : > { %2254 = sst [smem:[#allocation20_spill]] %s2253_s12  ;;  %s1170_s16 = sshll.u32 %s1809_s13, 7 }
  0x1f   : > { %s1231_s17 = sshll.u32 %s1682_s25, 11  ;;  %s285_s18 = scalar_lea.vmem [#allocation5], %s1170_s16 }
  0x20   : > { %s292_s19 = sshll.u32 %s285_s18, 4  ;;  %s2256_s1 = sld [smem:[#allocation22_spill]]  ;;  %s1825_s19 = int_to_ptr.vmem [resolvable:$true] %s292_s19 }
  0x21   : > { %s1827_s7 = scalar_lea.sflag [#allocation6], %s281_s15  ;;  %p1833_p2 = pneg %p1813_p0 }
  0x26   : > { %s1823_s8 = scalar_lea.hbm %s2256_s1, %s1231_s17  ;;  %s1455_s18 = scalar_lea.hbm %s2256_s1, 4096 }
  0x27   : > { %s1450_s28 = scalar_lea.hbm %s1823_s8, 2048  ;;  %p1456_p5 = scmp.lt.u32.totalorder %s1823_s8, %s2256_s1 }
  0x28   : > { %p1451_p1 = scmp.ne.s32.totalorder %s1823_s8, %s1450_s28  ;;  %p1457_p6 = scmp.lt.u32.totalorder %s1455_s18, %s1450_s28 }
  0x29   : > { %p1459_p10 = scmp.lt.u32.totalorder %s1450_s28, %s1823_s8 }
  0x2a   : > { %p1453_p3 = pnand %p1833_p2, %p1451_p1  ;;  %p1458_p7 = por %p1457_p6, %p1456_p5 }
  0x2c   : > { %p1454_p4 = pneg %p1453_p3  ;;  %p1460_p13 = por %p1459_p10, %p1458_p7 }
  0x2e   : > { %p1461_p12 = pnand %p1460_p13, %p1454_p4 }
  0x30   : > { %1464 = shalt.err (!%p1461_p12)
}
  0x31   : > { %s1465_s15 = scalar_lea.vmem %s1825_s19, 2048  ;;  %s1688_s16 = smov [#allocation5]  }
  0x32   : > { %p1466_p1 = scmp.ne.s32.totalorder %s1825_s19, %s1465_s15  ;;  %s1470_s17 = sshll.u32 %s1688_s16, 4  ;;  %s1471_s17 = int_to_ptr.vmem [resolvable:$false] %s1470_s17 }
  0x33   : > { %s1472_s20 = scalar_lea.vmem %s1471_s17, 4096  ;;  %p1473_p9 = scmp.lt.s32.totalorder %s1825_s19, %s1471_s17 }
  0x34   : > { %p1468_p3 = pnand %p1466_p1, %p1833_p2  ;;  %p1474_p8 = scmp.lt.s32.totalorder %s1472_s20, %s1465_s15 }
  0x36   : > { %p1469_p11 = pneg %p1468_p3  ;;  %p1475_p5 = por %p1474_p8, %p1473_p9 }
  0x38   : > { %p1476_p6 = pnand %p1475_p5, %p1469_p11 }
  0x3a   : > { %1479 = shalt.err (!%p1476_p6)
}
  0x3b   : > { %s2239_s28 = smov 128   ;;  %s2240_s18 = smov 8  }
  0x3c   : > { %1311 = dma.hbm_to_vmem [thread:$0]  (!%p1813_p0), %s1823_s8, 2048, %s1825_s19, %s1827_s7, %s2239_s28, %s2239_s28, %s2240_s18  }
  0x3d   : > { %p1176_p8 = scmp.ge.s32.totalorder %s1686_s26, 1  ;;  %p321_p9 = scmp.lt.s32.totalorder %s1686_s26, 3 }
  0x3e   : > { %s1168_s15 = sshll.u32 %s1809_s13, 5  ;;  %s1169_s16 = sshll.u32 %s1682_s25, 7 }
  0x3f   : > { %p1862_p11 = pnand %p1176_p8, %p321_p9  ;;  %s2259_s0 = sld [smem:[#allocation21_spill]] }
  0x40   : > { %s262_s11 = scalar_lea.vmem [#allocation2], %s1168_s15  ;;  %s1173_s19 = sshll.u32 %s1809_s13, 6 }
  0x41   : > { %s2258_s30 = scalar_select %p1862_p11, 1, 0 }
  0x42   : > { %s271_s23 = sshll.u32 %s262_s11, 4  ;;  %s259_s8 = scalar_lea.sflag [#allocation3], %s1809_s13  ;;  %s1873_s23 = int_to_ptr.vmem [resolvable:$true] %s271_s23 }
  0x45   : > { %s1871_s1 = scalar_lea.hbm %s2259_s0, %s1169_s16  ;;  %s1485_s16 = scalar_lea.hbm %s2259_s0, 1024 }
  0x46   : > { %s1480_s28 = scalar_lea.hbm %s1871_s1, 512  ;;  %p1486_p10 = scmp.lt.u32.totalorder %s1871_s1, %s2259_s0 }
  0x47   : > { %p1481_p12 = scmp.ne.s32.totalorder %s1871_s1, %s1480_s28  ;;  %p1487_p13 = scmp.lt.u32.totalorder %s1485_s16, %s1480_s28 }
  0x48   : > { %p1489_p3 = scmp.lt.u32.totalorder %s1480_s28, %s1871_s1 }
  0x49   : > { %p1483_p4 = pnand %p1481_p12, %p1833_p2  ;;  %p1488_p1 = por %p1487_p13, %p1486_p10 }
  0x4b   : > { %p1484_p7 = pneg %p1483_p4  ;;  %p1490_p5 = por %p1489_p3, %p1488_p1 }
  0x4d   : > { %p1491_p6 = pnand %p1490_p5, %p1484_p7 }
  0x4f   : > { %1494 = shalt.err (!%p1491_p6)
}
  0x50   : > { %s1495_s11 = scalar_lea.vmem %s1873_s23, 512  ;;  %s1691_s26 = smov [#allocation2]  }
  0x51   : > { %p1496_p8 = scmp.ne.s32.totalorder %s1873_s23, %s1495_s11  ;;  %s1500_s18 = sshll.u32 %s1691_s26, 4  ;;  %s1501_s18 = int_to_ptr.vmem [resolvable:$false] %s1500_s18 }
  0x52   : > { %s1502_s15 = scalar_lea.vmem %s1501_s18, 1024  ;;  %p1503_p4 = scmp.lt.s32.totalorder %s1873_s23, %s1501_s18 }
  0x53   : > { %p1498_p9 = pnand %p1496_p8, %p1833_p2  ;;  %p1504_p11 = scmp.lt.s32.totalorder %s1502_s15, %s1495_s11 }
  0x55   : > { %p1499_p12 = pneg %p1498_p9  ;;  %p1505_p10 = por %p1504_p11, %p1503_p4 }
  0x57   : > { %p1506_p13 = pnand %p1505_p10, %p1499_p12 }
  0x59   : > { %1509 = shalt.err (!%p1506_p13)
}
  0x5a   : > { %s1692_s28 = smov 256   ;;  %s2260_s16 = smov 8  }
  0x5b   : > { %s2261_s17 = smov 128   ;;  %s1232_s20 = sshll.u32 %s1682_s25, 10 }
  0x5c   : > { %1308 = dma.hbm_to_vmem [thread:$0]  (!%p1813_p0), %s1871_s1, 512, %s1873_s23, %s259_s8, %s1692_s28, %s2261_s17, %s2260_s16  }
  0x5d   : > { %s1906_s11 = scalar_lea.hbm %s2229_s2, %s1232_s20  ;;  %s306_s15 = scalar_lea.vmem [#allocation7], %s1173_s19 }
  0x5e   : > { %s313_s0 = sshll.u32 %s306_s15, 4  ;;  %s1510_s12 = scalar_lea.hbm %s1906_s11, 1024  ;;  %s1910_s0 = int_to_ptr.vmem [resolvable:$true] %s313_s0 }
  0x5f   : > { %p1511_p11 = scmp.ne.s32.totalorder %s1906_s11, %s1510_s12  ;;  %s1515_s8 = scalar_lea.hbm %s2229_s2, 2048 }
  0x60   : > { %p1516_p3 = scmp.lt.u32.totalorder %s1906_s11, %s2229_s2  ;;  %p1517_p5 = scmp.lt.u32.totalorder %s1515_s8, %s1510_s12 }
  0x61   : > { %p1513_p7 = pnand %p1511_p11, %p1833_p2  ;;  %p1519_p8 = scmp.lt.u32.totalorder %s1510_s12, %s1906_s11 }
  0x62   : > { %p1518_p6 = por %p1517_p5, %p1516_p3 }
  0x63   : > { %p1514_p1 = pneg %p1513_p7 }
  0x64   : > { %p1520_p9 = por %p1519_p8, %p1518_p6 }
  0x66   : > { %p1521_p12 = pnand %p1520_p9, %p1514_p1 }
  0x68   : > { %1524 = shalt.err (!%p1521_p12)
}
  0x69   : > { %s1525_s13 = scalar_lea.vmem %s1910_s0, 1024  ;;  %s1693_s19 = smov [#allocation7]  }
  0x6a   : > { %p1526_p4 = scmp.ne.s32.totalorder %s1910_s0, %s1525_s13  ;;  %s1530_s17 = sshll.u32 %s1693_s19, 4  ;;  %s1531_s17 = int_to_ptr.vmem [resolvable:$false] %s1530_s17 }
  0x6b   : > { %s1532_s20 = scalar_lea.vmem %s1531_s17, 2048  ;;  %p1533_p11 = scmp.lt.s32.totalorder %s1910_s0, %s1531_s17 }
  0x6c   : > { %p1528_p10 = pnand %p1526_p4, %p1833_p2  ;;  %p1534_p7 = scmp.lt.s32.totalorder %s1532_s20, %s1525_s13 }
  0x6e   : > { %p1529_p13 = pneg %p1528_p10  ;;  %p1535_p3 = por %p1534_p7, %p1533_p11 }
  0x70   : > { %p1536_p5 = pnand %p1535_p3, %p1529_p13 }
  0x72   : > { %1539 = shalt.err (!%p1536_p5)
}
  0x73   : > { %s1694_s12 = smov 64   ;;  %s1695_s26 = smov 4  }
  0x74   : > { %1314 = dma.hbm_to_vmem [thread:$0]  (!%p1813_p0), %s1906_s11, 1024, %s1910_s0, %s1827_s7, %s1694_s12, %s1694_s12, %s1695_s26  }
  0x75   : > { %p2262_p2 = scmp.ne.s32.totalorder %s2258_s30, 0 }
  0x76   : > { %s1937_s29 = sand.u32 (!%p2262_p2), 1, %s1670_s22   ;;  %p2263_p1 = scmp.ne.s32.totalorder (!%p2262_p2), %s2250_s9, 0 }
  0x77   : > { %325 = sbr.rel (%p2262_p2) target bundleno = 1181 (0x49d), region = 36  ;;  %s1940_s18 = sshll.u32 (!%p2262_p2), %s1937_s29, 5 }
  0x78   : > { %s328_s15 = scalar_lea.sflag (!%p2262_p2), [#allocation3], %s1937_s29  ;;  %s1944_s1 = scalar_lea.vmem (!%p2262_p2), [#allocation2], %s1940_s18 }
  0x7e   : > { %1649 = dma.done.wait (%p2263_p1), %s328_s15, 512  }
  0x7f   : > { %1651 = vsyncadd (%p2263_p1), %s328_s15, 4294966784  ;;  %s336_s0 = sand.u32 1, %s1769_s27   ;;  %s1178_s14 = sshll.u32 %s1937_s29, 7 }
  0x80   : > { %s337_s7 = scalar_lea.sflag [#allocation6], %s336_s0  ;;  %s1954_s30 = scalar_lea.vmem [#allocation5], %s1178_s14 }
  0x81   : > { %1653 = dma.done.wait (%p2263_p1), %s337_s7, 3072  }
  0x82   : > { %1655 = vsyncadd (%p2263_p1), %s337_s7, 4294964224  ;;  %v1696_v0 = vmov 0   ;;  %v1386_v1 = vld [vmem:[%s1954_s30] ss:$8 sps:$4 sm:$0xff]   ;;  %v1388_v2 = vld [vmem:[%s1954_s30 + $0x4] ss:$8 sps:$4 sm:$0xff]  }
  0x83   : > { %588 = vmatprep.mubr.bf16.mxu0 %v1696_v0  ;;  %1385 = vset.pattern.permute.xlu1 %v1696_v0  ;;  %v1389_v3 = vld [vmem:[%s1954_s30 + $0x14] ss:$8 sps:$4 sm:$0xff]   ;;  %v1391_v4 = vld [vmem:[%s1954_s30 + $0x10] ss:$8 sps:$4 sm:$0xff]   ;;  %v1392_v5 = vld [vmem:[%s1954_s30 + $0x24] ss:$8 sps:$4 sm:$0xff]  }
  0x84   : > { %1384 = vset.pattern.permute.xlu0 %v1696_v0  ;;  %556 = vmatprep.subr.bf16.mxu0 %v1388_v2  ;;  %v1394_v6 = vld [vmem:[%s1954_s30 + $0x20] ss:$8 sps:$4 sm:$0xff]   ;;  %v1395_v7 = vld [vmem:[%s1954_s30 + $0x34] ss:$8 sps:$4 sm:$0xff]   ;;  %v1397_v8 = vld [vmem:[%s1954_s30 + $0x30] ss:$8 sps:$4 sm:$0xff]  }
  0x85   : > { %557 = vmatpush1.bf16.msra.mxu0 %v1386_v1  ;;  %v1398_v9 = vld [vmem:[%s1954_s30 + $0x44] ss:$8 sps:$4 sm:$0xff]   ;;  %v1400_v10 = vld [vmem:[%s1954_s30 + $0x40] ss:$8 sps:$4 sm:$0xff]   ;;  %v1401_v11 = vld [vmem:[%s1954_s30 + $0x54] ss:$8 sps:$4 sm:$0xff]  }
  0x86   : > { %558 = vmatprep.subr.bf16.mxu0 %v1389_v3  ;;  %v1403_v12 = vld [vmem:[%s1954_s30 + $0x50] ss:$8 sps:$4 sm:$0xff]   ;;  %v1404_v13 = vld [vmem:[%s1954_s30 + $0x64] ss:$8 sps:$4 sm:$0xff]   ;;  %v1406_v14 = vld [vmem:[%s1954_s30 + $0x60] ss:$8 sps:$4 sm:$0xff]  }
  0x87   : > { %v1407_v15 = vld [vmem:[%s1954_s30 + $0x74] ss:$8 sps:$4 sm:$0xff]   ;;  %v1409_v16 = vld [vmem:[%s1954_s30 + $0x70] ss:$8 sps:$4 sm:$0xff]   ;;  %v1977_v17 = vld [vmem:[%s1944_s1] sm:$0xff]  ;;  %s1179_s9 = sshll.u32 %s1937_s29, 6 }
  0x88   : > { %v1980_v18 = vld [vmem:[%s1944_s1 + $0x8] sm:$0xff]  ;;  %v1985_v20 = vld [vmem:[%s1944_s1 + $0x10] sm:$0xff]  ;;  %v1988_v21 = vld [vmem:[%s1944_s1 + $0x18] sm:$0xff]  ;;  %s2001_s11 = scalar_lea.vmem [#allocation7], %s1179_s9  ;;  %v454_v51 = vmul.f32 %v1977_v17, %v1977_v17  ;;  %s2026_s13 = scalar_lea.vmem [#allocation11], %s1940_s18 }
  0x89   : > { %559 = vmatpush1.bf16.msra.mxu0 %v1391_v4  ;;  %v474_v19 = vpack.c.bf16 %v1980_v18, %v1977_v17  ;;  %v475_v22 = vpack.c.bf16 %v1988_v21, %v1985_v20  ;;  %v1410_v31 = vld [vmem:[%s2001_s11] sm:$0xff]   ;;  %v1411_v32 = vld [vmem:[%s2001_s11 + $0x8] sm:$0xff]   ;;  %v1412_v33 = vld [vmem:[%s2001_s11 + $0x10] sm:$0xff]   ;;  %v455_v53 = vmul.f32 %v1980_v18, %v1980_v18  ;;  %v456_v54 = vmul.f32 %v1985_v20, %v1985_v20  ;;  %s2053_s19 = scalar_lea.vmem [#allocation8], %s1940_s18  ;;  %s2074_s1 = sshll.u32 %s1678_s24, 7 }
  0x8a   : > { %560 = vmatprep.subr.bf16.mxu0 %v1392_v5  ;;  %1253 = vmatprep.subr.bf16.mxu1 %v1410_v31  ;;  %v1413_v34 = vld [vmem:[%s2001_s11 + $0x18] sm:$0xff]   ;;  %v1414_v35 = vld [vmem:[%s2001_s11 + $0x20] sm:$0xff]   ;;  %v1415_v55 = vld [vmem:[%s2001_s11 + $0x28] sm:$0xff]   ;;  %v457_v56 = vmul.f32 %v1988_v21, %v1988_v21  ;;  %s919_s15 = sshll.u32 %s2053_s19, 4  ;;  %s2088_s24 = scalar_lea.hbm %s2231_s4, %s2074_s1  ;;  %s2076_s15 = int_to_ptr.vmem [resolvable:$true] %s919_s15 }
  0x8b   : > { %1254 = vmatpush3.bf16.xpose.msra.mxu1 %v1410_v31  ;;  %v1416_v57 = vld [vmem:[%s2001_s11 + $0x30] sm:$0xff]   ;;  %v1417_v58 = vld [vmem:[%s2001_s11 + $0x38] sm:$0xff]   ;;  %v451_v59 = vld [vmem:[%s2230_s3 + $0x8] sm:$0xff]  ;;  %s894_s30 = scalar_lea.sflag [#allocation4], %s1937_s29  ;;  %s1540_s9 = scalar_lea.vmem %s2076_s15, 512 }
  0x8c   : > { %1255 = vmatprep.subr.bf16.mxu1 %v1411_v32  ;;  %v452_v60 = vld [vmem:[%s2230_s3 + $0x10] sm:$0xff]  ;;  %p1541_p0 = scmp.ne.s32.totalorder %s2076_s15, %s1540_s9  ;;  %p2264_p6 = scmp.ne.s32.totalorder %s2251_s10, 0 }
  0x8d   : > { %561 = vmatpush1.bf16.msra.mxu0 %v1394_v6  ;;  %s1697_s11 = smov [#allocation8]  }
  0x8e   : > { %562 = vmatprep.subr.bf16.mxu0 %v1395_v7  ;;  %p1542_p8 = pnand %p1541_p0, %p2264_p6  ;;  %s1544_s23 = sshll.u32 %s1697_s11, 4  ;;  %s1545_s23 = int_to_ptr.vmem [resolvable:$false] %s1544_s23 }
  0x8f   : > { %s1546_s8 = scalar_lea.vmem %s1545_s23, 1024  ;;  %p1547_p12 = scmp.lt.s32.totalorder %s2076_s15, %s1545_s23 }
  0x90   : > { %p1543_p9 = pneg %p1542_p8  ;;  %p1548_p4 = scmp.lt.s32.totalorder %s1546_s8, %s1540_s9 }
  0x91   : > { %563 = vmatpush1.bf16.msra.mxu0 %v1397_v8 }
  0x92   : > { %564 = vmatprep.subr.bf16.mxu0 %v1398_v9  ;;  %p1549_p10 = por %p1548_p4, %p1547_p12 }
  0x93   : > { %1256 = vmatpush3.bf16.xpose.msra.mxu1 %v1411_v32 }
  0x94   : > { %1257 = vmatprep.subr.bf16.mxu1 %v1412_v33  ;;  %p1550_p13 = pnand %p1549_p10, %p1543_p9 }
  0x95   : > { %565 = vmatpush1.bf16.msra.mxu0 %v1400_v10 }
  0x96   : > { %566 = vmatprep.subr.bf16.mxu0 %v1401_v11 }
  0x99   : > { %567 = vmatpush1.bf16.msra.mxu0 %v1403_v12 }
  0x9a   : > { %568 = vmatprep.subr.bf16.mxu0 %v1404_v13 }
  0x9b   : > { %1258 = vmatpush3.bf16.xpose.msra.mxu1 %v1412_v33 }
  0x9c   : > { %1259 = vmatprep.subr.bf16.mxu1 %v1413_v34 }
  0x9d   : > { %569 = vmatpush1.bf16.msra.mxu0 %v1406_v14 }
  0x9e   : > { %570 = vmatprep.subr.bf16.mxu0 %v1407_v15 }
  0xa1   : > { %571 = vmatpush1.bf16.msra.mxu0 %v1409_v16 }
  0xa2   : > { %1273 = vmatprep.subr.bf16.mxu0 %v1386_v1 }
  0xa3   : > { %1260 = vmatpush3.bf16.xpose.msra.mxu1 %v1413_v34 }
  0xa4   : > { %589 = vmatmul.mubr.bf16.vlgmr.msra.gmra.mrb[0].mxu0 %v474_v19  ;;  %1261 = vmatprep.subr.bf16.mxu1 %v1414_v35  ;;  %v839_v19 = vlaneseq }
  0xa5   : > { %598 = vmatprep.mubr.bf16.mxu0 %v1696_v0  ;;  %1274 = vmatpush3.bf16.msra.mxu0 %v1386_v1 }
  0xa6   : > { %1275 = vmatprep.subr.bf16.mxu0 %v1391_v4 }
  0xa9   : > { %1276 = vmatpush3.bf16.msra.mxu0 %v1391_v4 }
  0xaa   : > { %1277 = vmatprep.subr.bf16.mxu0 %v1394_v6 }
  0xab   : > { %1262 = vmatpush3.bf16.xpose.msra.mxu1 %v1414_v35 }
  0xac   : > { %599 = vmatmul.mubr.bf16.gmra.mrb[4].mxu0 %v475_v22  ;;  %1263 = vmatprep.subr.bf16.mxu1 %v1415_v55 }
  0xad   : > { %1278 = vmatpush3.bf16.msra.mxu0 %v1394_v6 }
  0xae   : > { %1279 = vmatprep.subr.bf16.mxu0 %v1397_v8 }
  0xb1   : > { %1280 = vmatpush3.bf16.msra.mxu0 %v1397_v8 }
  0xb2   : > { %1281 = vmatprep.subr.bf16.mxu0 %v1400_v10 }
  0xb3   : > { %1264 = vmatpush3.bf16.xpose.msra.mxu1 %v1415_v55 }
  0xb4   : > { %1265 = vmatprep.subr.bf16.mxu1 %v1416_v57 }
  0xb5   : > { %1282 = vmatpush3.bf16.msra.mxu0 %v1400_v10 }
  0xb6   : > { %1283 = vmatprep.subr.bf16.mxu0 %v1403_v12 }
  0xb9   : > { %1284 = vmatpush3.bf16.msra.mxu0 %v1403_v12 }
  0xba   : > { %1285 = vmatprep.subr.bf16.mxu0 %v1406_v14 }
  0xbb   : > { %1266 = vmatpush3.bf16.xpose.msra.mxu1 %v1416_v57 }
  0xbc   : > { %1267 = vmatprep.subr.bf16.mxu1 %v1417_v58 }
  0xbd   : > { %1286 = vmatpush3.bf16.msra.mxu0 %v1406_v14 }
  0xbe   : > { %1287 = vmatprep.subr.bf16.mxu0 %v1409_v16 }
  0xc1   : > { %1288 = vmatpush3.bf16.msra.mxu0 %v1409_v16 }
  0xc3   : > { %1268 = vmatpush3.bf16.xpose.msra.mxu1 %v1417_v58 }
 0x177   : > { %v1992_v23 = vpop.f32.mrb[0].mxu0 }
 0x178   : > { %v592_v24 = vpop.f32.mrb[1].mxu0 }
 0x179   : > { %613 = vmax.xlane.f32.xlu0 %v592_v24  ;;  %v1994_v25 = vpop.f32.mrb[2].mxu0 }
 0x17a   : > { %v596_v26 = vpop.f32.mrb[3].mxu0 }
 0x17d   : > { %615 = vmax.xlane.f32.xlu0 %v596_v26 }
 0x17f   : > { %v1996_v27 = vpop.f32.mrb[4].mxu0 }
 0x180   : > { %v602_v28 = vpop.f32.mrb[5].mxu0 }
 0x181   : > { %617 = vmax.xlane.f32.xlu1 %v602_v28  ;;  %v1998_v29 = vpop.f32.mrb[6].mxu0 }
 0x182   : > { %v606_v30 = vpop.f32.mrb[7].mxu0 }
 0x185   : > { %619 = vmax.xlane.f32.xlu1 %v606_v30 }
 0x206   : > { %v614_v36 = vpop.xlane.xlu0 %613 }
 0x207   : > { %v621_v37 = vsub.f32 %v592_v24, %v614_v36 }
 0x209   : > { %v625_v38 = vmul.f32 1.442695, %v621_v37 }
 0x20a   : > { %v616_v39 = vpop.xlane.xlu0 %615 }
 0x20b   : > { %1418 = vpow2.f32 %v625_v38  ;;  %v622_v40 = vsub.f32 %v596_v26, %v616_v39  ;;  %v2035_v26 = vand.u32 127, %v839_v19 }
 0x20d   : > { %v627_v41 = vmul.f32 1.442695, %v622_v40 }
 0x20e   : > { %v618_v42 = vpop.xlane.xlu1 %617 }
 0x20f   : > { %1420 = vpow2.f32 %v627_v41  ;;  %v623_v43 = vsub.f32 %v602_v28, %v618_v42 }
 0x211   : > { %v629_v44 = vmul.f32 1.442695, %v623_v43 }
 0x212   : > { %v620_v45 = vpop.xlane.xlu1 %619 }
 0x213   : > { %1422 = vpow2.f32 %v629_v44  ;;  %v624_v46 = vsub.f32 %v606_v30, %v620_v45 }
 0x215   : > { %v1419_v47 = vpop.eup %1418  ;;  %v631_v48 = vmul.f32 1.442695, %v624_v46 }
 0x216   : > { %633 = vadd.xlane.f32.xlu0 %v1419_v47 }
 0x217   : > { %1424 = vpow2.f32 %v631_v48 }
 0x219   : > { %v1421_v49 = vpop.eup %1420 }
 0x21a   : > { %635 = vadd.xlane.f32.xlu1 %v1421_v49 }
 0x21d   : > { %v1423_v50 = vpop.eup %1422 }
 0x21e   : > { %637 = vadd.xlane.f32.xlu0 %v1423_v50 }
 0x221   : > { %v1425_v52 = vpop.eup %1424 }
 0x222   : > { %639 = vadd.xlane.f32.xlu1 %v1425_v52  ;;  %458 = vadd.xlane.f32.xlu0 %v454_v51 }
 0x226   : > { %460 = vadd.xlane.f32.xlu1 %v455_v53  ;;  %462 = vadd.xlane.f32.xlu0 %v456_v54 }
 0x22a   : > { %464 = vadd.xlane.f32.xlu1 %v457_v56 }
 0x23b   : > { %845 = vperm.xlu1 %1385, %v451_v59  }
 0x23f   : > { %848 = vperm.xlu1 %1385, %v452_v60  }
 0x2a3   : > { %v634_v61 = vpop.xlane.xlu0 %633 }
 0x2a4   : > { %1426 = vrcp.f32 %v634_v61 }
 0x2a7   : > { %v636_v62 = vpop.xlane.xlu1 %635 }
 0x2a8   : > { %1428 = vrcp.f32 %v636_v62 }
 0x2ab   : > { %v638_v63 = vpop.xlane.xlu0 %637 }
 0x2ac   : > { %1430 = vrcp.f32 %v638_v63 }
 0x2ae   : > { %v1427_v0 = vpop.eup %1426 }
 0x2af   : > { %v640_v1 = vpop.xlane.xlu1 %639  ;;  %v459_v2 = vpop.xlane.xlu0 %458  ;;  %v645_v3 = vmul.f32 %v1427_v0, %v1419_v47 }
 0x2b0   : > { %1432 = vrcp.f32 %v640_v1  ;;  %v466_v4 = vmax.f32 %v459_v2, 1e-24 }
 0x2b1   : > { %889 = vst [vmem:[%s2026_s13] sm:$0xff] %v645_v3 }
 0x2b2   : > { %v1429_v5 = vpop.eup %1428  ;;  %1434 = vrsqrt.f32 %v466_v4 }
 0x2b3   : > { %v461_v6 = vpop.xlane.xlu1 %460  ;;  %v463_v7 = vpop.xlane.xlu0 %462  ;;  %v646_v8 = vmul.f32 %v1429_v5, %v1421_v49  ;;  %v453_v49 = vld [vmem:[%s2230_s3 + $0x18] sm:$0xff] }
 0x2b4   : > { %v467_v9 = vmax.f32 %v461_v6, 1e-24  ;;  %v468_v10 = vmax.f32 %v463_v7, 1e-24 }
 0x2b5   : > { %v649_v11 = vpack.c.bf16 %v646_v8, %v645_v3  ;;  %890 = vst [vmem:[%s2026_s13 + $0x8] sm:$0xff] %v646_v8 }
 0x2b6   : > { %v1431_v12 = vpop.eup %1430  ;;  %1436 = vrsqrt.f32 %v467_v9 }
 0x2b7   : > { %1438 = vrsqrt.f32 %v468_v10  ;;  %1269 = vmatprep.mubr.bf16.mxu1 %v649_v11  ;;  %v465_v13 = vpop.xlane.xlu1 %464  ;;  %v647_v14 = vmul.f32 %v1431_v12, %v1423_v50  ;;  %v450_v50 = vld [vmem:[%s2230_s3] sm:$0xff] }
 0x2b8   : > { %v469_v15 = vmax.f32 %v465_v13, 1e-24 }
 0x2b9   : > { %891 = vst [vmem:[%s2026_s13 + $0x10] sm:$0xff] %v647_v14 }
 0x2ba   : > { %v1433_v16 = vpop.eup %1432  ;;  %1440 = vrsqrt.f32 %v469_v15 }
 0x2bb   : > { %v648_v17 = vmul.f32 %v1433_v16, %v1425_v52  ;;  %v2031_v20 = vpop.permute.xlu1 %845 }
 0x2bc   : > { %v1435_v18 = vpop.eup %1434  ;;  %vm854_vm0 = vcmp.eq.s32.totalorder %v2035_v26, %v2031_v20 }
 0x2bd   : > { %v650_v21 = vpack.c.bf16 %v648_v17, %v647_v14  ;;  %892 = vst [vmem:[%s2026_s13 + $0x18] sm:$0xff] %v648_v17  ;;  %v609_v22 = vmul.f32 %v1435_v18, %v1992_v23 }
 0x2bf   : > { %1270 = vmatmul.mubr.bf16.vlgmr.msra.gmra.mrb[0].mxu1 %v650_v21  ;;  %v2038_v31 = vpop.permute.xlu1 %848  ;;  %v1207_v56 = vclamps-f32 %v609_v22, 1.0 }
 0x2c0   : > { %v1437_v24 = vpop.eup %1436  ;;  %vm855_vm1 = vcmp.eq.s32.totalorder %v2035_v26, %v2038_v31 }
 0x2c1   : > { %v1439_v28 = vpop.eup %1438  ;;  %v610_v30 = vmul.f32 %v1437_v24, %v1994_v25  ;;  %v1215_v60 = vadd.f32 -0.5, %v1207_v56 }
 0x2c2   : > { %v611_v32 = vmul.f32 %v1439_v28, %v1996_v27 }
 0x2c3   : > { %v1208_v33 = vclamps-f32 %v610_v30, 1.0 }
 0x2c4   : > { %v1441_v34 = vpop.eup %1440  ;;  %v1209_v35 = vclamps-f32 %v611_v32, 1.0 }
 0x2c5   : > { %v1216_v36 = vadd.f32 -0.5, %v1208_v33  ;;  %v612_v23 = vmul.f32 %v1441_v34, %v1998_v29 }
 0x2c6   : > { %v1217_v37 = vadd.f32 -0.5, %v1209_v35 }
 0x2c7   : > { %v862_v25 = vsel %vm854_vm0, %v1216_v36, %v1208_v33  ;;  %v1210_v54 = vclamps-f32 %v612_v23, 1.0 }
 0x2c8   : > { %v866_v38 = vmul.f32 30.0, %v862_v25  ;;  %v863_v27 = vsel %vm855_vm1, %v1217_v37, %v1209_v35 }
 0x2c9   : > { %v867_v39 = vmul.f32 30.0, %v863_v27  ;;  %v1218_v57 = vadd.f32 -0.5, %v1210_v54 }
 0x2ca   : > { %870 = vst [vmem:[%s2053_s19 + $0x8] sm:$0xff] %v866_v38 }
 0x2cb   : > { %871 = vst [vmem:[%s2053_s19 + $0x10] sm:$0xff] %v867_v39 }
 0x392   : > { %v1271_v40 = vpop.f32.mrb[0].mxu1 }
 0x393   : > { %v733_v41 = vpop.f32.mrb[1].mxu1  ;;  %v750_v29 = vmul.f32 %v1271_v40, %v1271_v40 }
 0x394   : > { %v1272_v42 = vpop.f32.mrb[2].mxu1  ;;  %v748_v47 = vmul.f32 %v733_v41, %v733_v41 }
 0x395   : > { %v769_v43 = vpack.c.bf16 %v1272_v42, %v1271_v40  ;;  %v736_v44 = vpop.f32.mrb[3].mxu1  ;;  %756 = vadd.xlane.f32.xlu0 %v750_v29  ;;  %v751_v45 = vmul.f32 %v1272_v42, %v1272_v42 }
 0x396   : > { %v768_v46 = vpack.c.bf16 %v736_v44, %v733_v41  ;;  %v749_v48 = vmul.f32 %v736_v44, %v736_v44 }
 0x397   : > { %758 = vadd.xlane.f32.xlu1 %v751_v45 }
 0x398   : > { %1289 = vmatprep.mubr.bf16.mxu0 %v768_v46 }
 0x399   : > { %1290 = vmatmul.mubr.bf16.vlgmr.msra.gmra.mrb[8].mxu0 %v769_v43  ;;  %752 = vadd.xlane.f32.xlu0 %v748_v47 }
 0x39b   : > { %754 = vadd.xlane.f32.xlu1 %v749_v48 }
 0x3ac   : > { %851 = vperm.xlu1 %1385, %v453_v49  }
 0x3af   : > { %842 = vperm.xlu0 %1384, %v450_v50  }
 0x422   : > { %v757_v51 = vpop.xlane.xlu0 %756 }
 0x424   : > { %v759_v52 = vpop.xlane.xlu1 %758 }
 0x426   : > { %v753_v55 = vpop.xlane.xlu0 %752 }
 0x428   : > { %v755_v53 = vpop.xlane.xlu1 %754 }
 0x42c   : > { %v2064_v58 = vpop.permute.xlu1 %851 }
 0x42d   : > { %vm856_vm2 = vcmp.eq.s32.totalorder %v2035_v26, %v2064_v58 }
 0x42e   : > { %v864_v59 = vsel %vm856_vm2, %v1218_v57, %v1210_v54  ;;  %v2071_v61 = vpop.permute.xlu0 %842 }
 0x42f   : > { %v868_v62 = vmul.f32 30.0, %v864_v59  ;;  %vm853_vm3 = vcmp.eq.s32.totalorder %v2035_v26, %v2071_v61 }
 0x430   : > { %v861_v63 = vsel %vm853_vm3, %v1215_v60, %v1207_v56 }
 0x431   : > { %872 = vst [vmem:[%s2053_s19 + $0x18] sm:$0xff] %v868_v62  ;;  %v865_v0 = vmul.f32 30.0, %v861_v63 }
 0x433   : > { %869 = vst [vmem:[%s2053_s19] sm:$0xff] %v865_v0 }
 0x434   : > { %1553 = shalt.err (!%p1550_p13)
}
 0x435   : > { %s1554_s28 = scalar_lea.hbm %s2088_s24, 512  ;;  %s1558_s17 = scalar_lea.hbm %s2231_s4, 1024 }
 0x436   : > { %p1555_p11 = scmp.ne.s32.totalorder %s2088_s24, %s1554_s28  ;;  %p1559_p5 = scmp.lt.u32.totalorder %s2088_s24, %s2231_s4 }
 0x437   : > { %p1560_p2 = scmp.lt.u32.totalorder %s1558_s17, %s1554_s28  ;;  %p1562_p0 = scmp.lt.u32.totalorder %s1554_s28, %s2088_s24 }
 0x438   : > { %p1556_p7 = pnand %p1555_p11, %p2264_p6 }
 0x439   : > { %p1561_p1 = por %p1560_p2, %p1559_p5 }
 0x43a   : > { %p1557_p3 = pneg %p1556_p7 }
 0x43b   : > { %p1563_p8 = por %p1562_p0, %p1561_p1 }
 0x43d   : > { %p1564_p9 = pnand %p1563_p8, %p1557_p3 }
 0x43f   : > { %1567 = shalt.err (!%p1564_p9)
}
 0x440   : > { %s1698_s26 = smov 128   ;;  %s1699_s14 = smov 256   ;;  %v762_v1 = vmax.f32 %v757_v51, 1e-24  ;;  %v760_v2 = vmax.f32 %v753_v55, 1e-24 }
 0x441   : > { %s1700_s7 = smov 8   ;;  %v763_v3 = vmax.f32 %v759_v52, 1e-24  ;;  %v761_v4 = vmax.f32 %v755_v53, 1e-24  ;;  %s395_s29 = scalar_lea.vmem [#allocation9], %s1940_s18 }
 0x442   : > { %1299 = dma.vmem_to_hbm [thread:$0]  (%p2264_p6), %s2076_s15, 512, %s2088_s24, %s894_s30, %s1698_s26, %s1699_s14, %s1700_s7   ;;  %1442 = vrsqrt.f32 %v762_v1 }
 0x443   : > { %1444 = vrsqrt.f32 %v760_v2  ;;  %s937_s15 = sshll.u32 %s395_s29, 4  ;;  %s955_s24 = sshll.u32 %s2026_s13, 4  ;;  %s2129_s15 = int_to_ptr.vmem [resolvable:$true] %s937_s15  ;;  %s2140_s24 = int_to_ptr.vmem [resolvable:$true] %s955_s24 }
 0x444   : > { %1446 = vrsqrt.f32 %v763_v3  ;;  %s2138_s30 = scalar_lea.hbm %s2232_s5, %s2074_s1  ;;  %s2146_s23 = scalar_lea.hbm %s2233_s6, %s2074_s1 }
 0x445   : > { %1448 = vrsqrt.f32 %v761_v4  ;;  %s2150_s8 = scalar_lea.sflag [#allocation10], %s336_s0  ;;  %s1568_s28 = scalar_lea.vmem %s2129_s15, 512 }
 0x446   : > { %p1569_p12 = scmp.ne.s32.totalorder %s2129_s15, %s1568_s28  ;;  %s1701_s16 = smov [#allocation9]  }
 0x447   : > { %s1572_s19 = sshll.u32 %s1701_s16, 4  ;;  %s1573_s19 = int_to_ptr.vmem [resolvable:$false] %s1572_s19 }
 0x448   : > { %p1570_p4 = pnand %p1569_p12, %p2264_p6  ;;  %s1574_s17 = scalar_lea.vmem %s1573_s19, 1024 }
 0x449   : > { %p1575_p13 = scmp.lt.s32.totalorder %s2129_s15, %s1573_s19  ;;  %p1576_p11 = scmp.lt.s32.totalorder %s1574_s17, %s1568_s28 }
 0x44a   : > { %p1571_p10 = pneg %p1570_p4 }
 0x44b   : > { %p1577_p7 = por %p1576_p11, %p1575_p13 }
 0x44c   : > { %v1443_v5 = vpop.eup %1442 }
 0x44d   : > { %v1445_v7 = vpop.eup %1444  ;;  %p1578_p3 = pnand %p1577_p7, %p1571_p10 }
 0x44e   : > { %v1447_v10 = vpop.eup %1446 }
 0x44f   : > { %v1449_v13 = vpop.eup %1448 }
 0x46c   : > { %v1291_v6 = vpop.f32.mrb[8].mxu0 }
 0x46d   : > { %v821_v8 = vmul.f32 %v1443_v5, %v1291_v6  ;;  %v804_v9 = vpop.f32.mrb[9].mxu0 }
 0x46e   : > { %v819_v11 = vmul.f32 %v1445_v7, %v804_v9  ;;  %v1292_v12 = vpop.f32.mrb[10].mxu0 }
 0x46f   : > { %v1213_v14 = vclamps-f32 %v821_v8, 1.0  ;;  %v822_v15 = vmul.f32 %v1447_v10, %v1292_v12  ;;  %v807_v16 = vpop.f32.mrb[11].mxu0 }
 0x470   : > { %v1211_v17 = vclamps-f32 %v819_v11, 1.0  ;;  %v820_v18 = vmul.f32 %v1449_v13, %v807_v16 }
 0x471   : > { %v1221_v19 = vadd.f32 -0.5, %v1213_v14  ;;  %v1214_v21 = vclamps-f32 %v822_v15, 1.0 }
 0x472   : > { %v1219_v22 = vadd.f32 -0.5, %v1211_v17  ;;  %v1212_v24 = vclamps-f32 %v820_v18, 1.0 }
 0x473   : > { %v879_v28 = vsel %vm855_vm1, %v1221_v19, %v1213_v14  ;;  %v1222_v30 = vadd.f32 -0.5, %v1214_v21 }
 0x474   : > { %v883_v32 = vmul.f32 30.0, %v879_v28  ;;  %v877_v33 = vsel %vm853_vm3, %v1219_v22, %v1211_v17  ;;  %v1220_v34 = vadd.f32 -0.5, %v1212_v24 }
 0x475   : > { %v881_v35 = vmul.f32 30.0, %v877_v33  ;;  %v880_v31 = vsel %vm856_vm2, %v1222_v30, %v1214_v21 }
 0x476   : > { %887 = vst [vmem:[%s395_s29 + $0x10] sm:$0xff] %v883_v32  ;;  %v884_v36 = vmul.f32 30.0, %v880_v31  ;;  %v878_v23 = vsel %vm854_vm0, %v1220_v34, %v1212_v24 }
 0x477   : > { %885 = vst [vmem:[%s395_s29] sm:$0xff] %v881_v35  ;;  %v882_v37 = vmul.f32 30.0, %v878_v23 }
 0x478   : > { %888 = vst [vmem:[%s395_s29 + $0x18] sm:$0xff] %v884_v36 }
 0x479   : > { %886 = vst [vmem:[%s395_s29 + $0x8] sm:$0xff] %v882_v37 }
 0x47a   : > { %1581 = shalt.err (!%p1578_p3)
}
 0x47b   : > { %s1582_s27 = scalar_lea.hbm %s2138_s30, 512  ;;  %s1586_s20 = scalar_lea.hbm %s2232_s5, 1024 }
 0x47c   : > { %p1583_p5 = scmp.ne.s32.totalorder %s2138_s30, %s1582_s27  ;;  %p1587_p0 = scmp.lt.u32.totalorder %s2138_s30, %s2232_s5 }
 0x47d   : > { %p1588_p8 = scmp.lt.u32.totalorder %s1586_s20, %s1582_s27  ;;  %p1590_p12 = scmp.lt.u32.totalorder %s1582_s27, %s2138_s30 }
 0x47e   : > { %p1584_p2 = pnand %p1583_p5, %p2264_p6 }
 0x47f   : > { %p1589_p9 = por %p1588_p8, %p1587_p0 }
 0x480   : > { %p1585_p1 = pneg %p1584_p2 }
 0x481   : > { %p1591_p4 = por %p1590_p12, %p1589_p9 }
 0x483   : > { %p1592_p10 = pnand %p1591_p4, %p1585_p1 }
 0x485   : > { %1595 = shalt.err (!%p1592_p10)
}
 0x486   : > { %1300 = dma.vmem_to_hbm [thread:$0]  (%p2264_p6), %s2129_s15, 512, %s2138_s30, %s2150_s8, %s1698_s26, %s1699_s14, %s1700_s7  }
 0x487   : > { %s1596_s18 = scalar_lea.vmem %s2140_s24, 512  ;;  %s1702_s13 = smov [#allocation11]  }
 0x488   : > { %p1597_p13 = scmp.ne.s32.totalorder %s2140_s24, %s1596_s18  ;;  %s1600_s9 = sshll.u32 %s1702_s13, 4  ;;  %s1601_s9 = int_to_ptr.vmem [resolvable:$false] %s1600_s9 }
 0x489   : > { %s1602_s11 = scalar_lea.vmem %s1601_s9, 1024  ;;  %p1603_p3 = scmp.lt.s32.totalorder %s2140_s24, %s1601_s9 }
 0x48a   : > { %p1598_p11 = pnand %p1597_p13, %p2264_p6  ;;  %p1604_p5 = scmp.lt.s32.totalorder %s1602_s11, %s1596_s18 }
 0x48c   : > { %p1599_p7 = pneg %p1598_p11  ;;  %p1605_p2 = por %p1604_p5, %p1603_p3 }
 0x48e   : > { %p1606_p1 = pnand %p1605_p2, %p1599_p7 }
 0x490   : > { %1609 = shalt.err (!%p1606_p1)
}
 0x491   : > { %s1610_s15 = scalar_lea.hbm %s2146_s23, 512  ;;  %s1614_s16 = scalar_lea.hbm %s2233_s6, 1024 }
 0x492   : > { %p1611_p0 = scmp.ne.s32.totalorder %s2146_s23, %s1610_s15  ;;  %p1615_p12 = scmp.lt.u32.totalorder %s2146_s23, %s2233_s6 }
 0x493   : > { %p1616_p4 = scmp.lt.u32.totalorder %s1614_s16, %s1610_s15  ;;  %p1618_p13 = scmp.lt.u32.totalorder %s1610_s15, %s2146_s23 }
 0x494   : > { %p1612_p8 = pnand %p1611_p0, %p2264_p6 }
 0x495   : > { %p1617_p10 = por %p1616_p4, %p1615_p12 }
 0x496   : > { %p1613_p9 = pneg %p1612_p8 }
 0x497   : > { %p1619_p11 = por %p1618_p13, %p1617_p10 }
 0x499   : > { %p1620_p7 = pnand %p1619_p11, %p1613_p9 }
 0x49b   : > { %1623 = shalt.err (!%p1620_p7)
}
 0x49c   : > { %1301 = dma.vmem_to_hbm [thread:$0]  (%p2264_p6), %s2140_s24, 512, %s2146_s23, %s2150_s8, %s1698_s26, %s1699_s14, %s1700_s7  }
 0x49d PF: > { %s2265_s27 = sld [smem:[#allocation20_spill]]  ;;  %s2266_s0 = sld [smem:[#allocation17_spill]] }
 0x49e   : > { %s970_s1 = sand.u32 1, %s1666_s21  }
 0x49f   : > { %s971_s20 = scalar_lea.sflag [#allocation4], %s970_s1 }
 0x4a3   : > { %p2267_p3 = scmp.ne.s32.totalorder %s2265_s27, 0  ;;  %p2268_p5 = scmp.ge.s32.totalorder %s2266_s0, 2 }
 0x4a5   : > { %p1316_p2 = pnand %p2268_p5, %p2267_p3 }
 0x4a7   : > { %1657 = dma.done.wait (!%p1316_p2), %s971_s20, 512  }
 0x4a8   : > { %1659 = vsyncadd (!%p1316_p2), %s971_s20, 4294966784  ;;  %s2269_s10 = sadd.s32 4294967294, %s2266_s0  }
 0x4a9   : > { %s979_s12 = sand.u32 1, %s2269_s10  }
 0x4aa   : > { %s980_s29 = scalar_lea.sflag [#allocation10], %s979_s12 }
 0x4ab   : > { %1661 = dma.done.wait (!%p1316_p2), %s980_s29, 1024  }
 0x4ac   : > { %1663 = vsyncadd (!%p1316_p2), %s980_s29, 4294966272  ;;  %s29_s26 = sadd.s32 1, %s2266_s0   ;;  %s2270_s14 = sld [smem:[#allocation16_spill]] }
 0x4ad   : > { %p26_p6 = scmp.ge.s32.totalorder %s29_s26, 4   ;;  %s2271_s23 = sld [smem:[#allocation19_spill]] }
 0x4ae   : > { %s2272_s7 = sld [smem:[#allocation18_spill]]  ;;  %s2273_s21 = smov %s1670_s22 }
 0x4af   : > { %s2275_s24 = smov %s1682_s25  ;;  %28 = sbr.rel (!%p26_p6) target bundleno = 13 (0xd), region = 140 }
 0x4b2   : > { %s2274_s22 = smov %s2270_s14 }
 0x4b4   : > { %s2276_s25 = smov %s2272_s7 }
 0x4b6   :  { %994 = vsyncpa [#allocation3], 1 }
 0x4b7   :  { %996 = vsyncpa [#allocation3 + $0x1], 1 }
 0x4b8   :  { %997 = vsyncpa [#allocation6], 1 }
 0x4b9   :  { %999 = vsyncpa [#allocation6 + $0x1], 1 }
 0x4ba   :  { %1000 = vsyncpa [#allocation4], 1 }
 0x4bb   :  { %1002 = vsyncpa [#allocation4 + $0x1], 1 }
 0x4bc   :  { %1003 = vsyncpa [#allocation10], 1 }
 0x4bd   :  { %1005 = vsyncpa [#allocation10 + $0x1], 1 }

</bundles_post_ra>
